<compile_context>
chip_gen: v5e
topology: v5e:2x2
jax: 0.10.0
libtpu: 0.0.40
codegen_flags: <defaults>
</compile_context>

<pallas_src>
import jax
import jax.numpy as jnp
from jax.experimental import pallas as pl
from jax.experimental.pallas import tpu as pltpu


def _affine_kernel(x_ref, s_ref, b_ref, o_ref):
    # x_ref: (R, T); s_ref/b_ref broadcast against it ((R, 1) or (1, T)).
    x = x_ref[...].astype(jnp.float32)
    o_ref[...] = (x * s_ref[...] + b_ref[...]).astype(o_ref.dtype)


def _affine_rows(x_rows, s_rows, b_rows, *, lane_tile_target=2048, row_tile_target=256):
    """Per-row affine: o[r, :] = x[r, :] * s[r] + b[r]."""
    R, L = x_rows.shape
    lane_tile = L if L <= lane_tile_target else lane_tile_target   # mult of 128 or full dim
    row_tile = R if R <= row_tile_target else row_tile_target      # mult of 8 or full dim
    grid = (pl.cdiv(R, row_tile), pl.cdiv(L, lane_tile))
    return pl.pallas_call(
        _affine_kernel,
        out_shape=jax.ShapeDtypeStruct((R, L), x_rows.dtype),
        grid_spec=pltpu.PrefetchScalarGridSpec(
            num_scalar_prefetch=0,
            grid=grid,
            in_specs=[
                pl.BlockSpec((row_tile, lane_tile), lambda r, t: (r, t)),
                pl.BlockSpec((row_tile, 1), lambda r, t: (r, 0)),
                pl.BlockSpec((row_tile, 1), lambda r, t: (r, 0)),
            ],
            out_specs=pl.BlockSpec((row_tile, lane_tile), lambda r, t: (r, t)),
        ),
        compiler_params=pltpu.CompilerParams(
            dimension_semantics=("parallel", "parallel")),
    )(x_rows, s_rows, b_rows)


def _affine_cols(x, s_1l, b_1l, *, lane_tile_target=2048, row_tile_target=256):
    """Per-column affine: o[:, j] = x[:, j] * s[j] + b[j]."""
    R, L = x.shape
    lane_tile = L if L <= lane_tile_target else lane_tile_target
    row_tile = R if R <= row_tile_target else row_tile_target
    grid = (pl.cdiv(R, row_tile), pl.cdiv(L, lane_tile))
    return pl.pallas_call(
        _affine_kernel,
        out_shape=jax.ShapeDtypeStruct((R, L), x.dtype),
        grid_spec=pltpu.PrefetchScalarGridSpec(
            num_scalar_prefetch=0,
            grid=grid,
            in_specs=[
                pl.BlockSpec((row_tile, lane_tile), lambda r, t: (r, t)),
                pl.BlockSpec((1, lane_tile), lambda r, t: (0, t)),
                pl.BlockSpec((1, lane_tile), lambda r, t: (0, t)),
            ],
            out_specs=pl.BlockSpec((row_tile, lane_tile), lambda r, t: (r, t)),
        ),
        compiler_params=pltpu.CompilerParams(
            dimension_semantics=("parallel", "parallel")),
    )(x, s_1l, b_1l)


def actnorm_forward(x, loc, scale, *, logdet=False, reverse=False):
    """ActNorm forward pass (reverse=True mirrors module.forward(input, reverse=True)).

    x     : (N, C, H, W) or (N, C); f32 or bf16
    loc   : (1, C, 1, 1)
    scale : (1, C, 1, 1)
    """
    scale_f32 = scale.reshape(-1).astype(jnp.float32)   # (C,)
    loc_f32 = loc.reshape(-1).astype(jnp.float32)        # (C,)
    C = scale_f32.shape[0]

    if reverse:
        # x / scale - loc  ==  x * (1/scale) + (-loc)
        s_f32 = 1.0 / scale_f32
        b_f32 = -loc_f32
    else:
        # scale * (x + loc) ==  x * scale + scale*loc
        s_f32 = scale_f32
        b_f32 = scale_f32 * loc_f32

    squeeze = x.ndim == 2
    if squeeze:
        N = x.shape[0]
        H = W = 1
        x4 = x.reshape(N, C, 1, 1)
    else:
        N, _, H, W = x.shape
        x4 = x
    HW = H * W

    if HW >= 128:
        # Lane-dense per-(n, c) rows: (N*C, HW) with (N*C, 1) params.
        x_rows = x4.reshape(N * C, HW)
        s_rows = jnp.broadcast_to(s_f32[None, :, None], (N, C, 1)).reshape(N * C, 1)
        b_rows = jnp.broadcast_to(b_f32[None, :, None], (N, C, 1)).reshape(N * C, 1)
        h = _affine_rows(x_rows, s_rows, b_rows).reshape(N, C, H, W)
    else:
        # Small spatial dim (or 2-D input): flatten channels*spatial into lanes.
        x_flat = x4.reshape(N, C * HW)
        s_cols = jnp.repeat(s_f32, HW).reshape(1, C * HW)
        b_cols = jnp.repeat(b_f32, HW).reshape(1, C * HW)
        h = _affine_cols(x_flat, s_cols, b_cols).reshape(N, C, H, W)

    if squeeze:
        h = h.reshape(N, C)

    if reverse:
        return h
    if logdet:
        # Hoisted out of the kernel: depends only on `scale`; kept in f32.
        ld = (H * W) * jnp.sum(jnp.log(jnp.abs(scale_f32)))
        ld = jnp.full((N,), ld).astype(x.dtype)
        return h, ld
    return h


def _reference(x, loc, scale, *, logdet=False, reverse=False):
    squeeze = x.ndim == 2
    if squeeze:
        x = x[:, :, None, None]
    N, C, H, W = x.shape
    xf = x.astype(jnp.float32)
    if reverse:
        h = (xf / scale - loc).astype(x.dtype)
    else:
        h = (scale * (xf + loc)).astype(x.dtype)
    if squeeze:
        h = h[:, :, 0, 0]
    if reverse:
        return h
    if logdet:
        ld = H * W * jnp.sum(jnp.log(jnp.abs(scale)))
        return h, (ld * jnp.ones((N,))).astype(x.dtype)
    return h


if __name__ == "__main__":
    num_features = 4
    key = jax.random.PRNGKey(0)
    kx, kl, ks, k2, k3 = jax.random.split(key, 5)

    # Parameters (module __init__ shape (1, C, 1, 1)); non-trivial values to
    # exercise the broadcast/affine path.
    loc = jax.random.normal(kl, (1, num_features, 1, 1), dtype=jnp.float32) * 0.1
    scale = 1.0 + 0.5 * jax.random.uniform(ks, (1, num_features, 1, 1), dtype=jnp.float32)

    # 4-D conv-style input (NCHW), HW >= 128 -> per-row path
    x4 = jax.random.normal(kx, (2, num_features, 16, 16), dtype=jnp.float32)
    h4 = actnorm_forward(x4, loc, scale, logdet=False)
    jax.block_until_ready(h4)
    assert jnp.allclose(h4, _reference(x4, loc, scale), atol=1e-5, rtol=1e-5)

    # logdet branch
    h4b, ld = actnorm_forward(x4, loc, scale, logdet=True)
    jax.block_until_ready((h4b, ld))
    ref_h, ref_ld = _reference(x4, loc, scale, logdet=True)
    assert jnp.allclose(h4b, ref_h, atol=1e-5, rtol=1e-5)
    assert jnp.allclose(ld, ref_ld, atol=1e-4, rtol=1e-5)

    # reverse branch (module.forward(input, reverse=True))
    h4r = actnorm_forward(x4, loc, scale, reverse=True)
    jax.block_until_ready(h4r)
    assert jnp.allclose(h4r, _reference(x4, loc, scale, reverse=True), atol=1e-5, rtol=1e-5)

    # 2-D input path (squeeze semantics) -> per-column path
    x2 = jax.random.normal(k2, (2, num_features), dtype=jnp.float32)
    h2 = actnorm_forward(x2, loc, scale, logdet=False)
    jax.block_until_ready(h2)
    assert jnp.allclose(h2, _reference(x2, loc, scale), atol=1e-5, rtol=1e-5)

    # small spatial dims (HW < 128) -> flattened per-column path
    xs = jax.random.normal(k3, (2, num_features, 4, 4), dtype=jnp.float32)
    hs = actnorm_forward(xs, loc, scale, logdet=False)
    jax.block_until_ready(hs)
    assert jnp.allclose(hs, _reference(xs, loc, scale), atol=1e-5, rtol=1e-5)

    # bf16 I/O path (f32 compute inside the kernel)
    x4_bf16 = x4.astype(jnp.bfloat16)
    h4_bf16 = actnorm_forward(x4_bf16, loc, scale, logdet=False)
    jax.block_until_ready(h4_bf16)
    ref_bf16 = _reference(x4_bf16, loc, scale)
    assert jnp.allclose(h4_bf16.astype(jnp.float32), ref_bf16.astype(jnp.float32),
                        atol=2e-2, rtol=2e-2)

    # TODO(synk): data-dependent initialize() (training-mode first-batch stats)
    # is stateful module logic, not part of the inference hot path; omitted.
    print("KERNEL_OK")
</pallas_src>

<mosaic_0001>
module attributes {stable_mosaic.version = 11 : i64} {
  func.func @_affine_kernel(%arg0: i32, %arg1: i32, %arg2: memref<8x256xf32, #tpu.memory_space<vmem>>, %arg3: memref<8x1xf32, #tpu.memory_space<vmem>>, %arg4: memref<8x1xf32, #tpu.memory_space<vmem>>, %arg5: memref<8x256xf32, #tpu.memory_space<vmem>>) attributes {dimension_semantics = [#tpu.dimension_semantics<parallel>, #tpu.dimension_semantics<parallel>], iteration_bounds = array<i64: 1, 1>, scalar_prefetch = 0 : i64, scratch_operands = 0 : i64, tpu.core_type = #tpu.core_type<tc>, window_params = [{transform_indices = @transform_0, window_bounds = array<i64: 8, 256>}, {transform_indices = @transform_1, window_bounds = array<i64: 8, 1>}, {transform_indices = @transform_2, window_bounds = array<i64: 8, 1>}, {transform_indices = @transform_3, window_bounds = array<i64: 8, 256>}]} {
    %c0 = arith.constant 0 : index
    %c0_0 = arith.constant 0 : index
    %0 = vector.load %arg2[%c0, %c0_0] : memref<8x256xf32, #tpu.memory_space<vmem>>, vector<8x256xf32>
    %c0_1 = arith.constant 0 : index
    %c0_2 = arith.constant 0 : index
    %1 = vector.load %arg3[%c0_1, %c0_2] : memref<8x1xf32, #tpu.memory_space<vmem>>, vector<8x1xf32>
    %2 = vector.broadcast %1 : vector<8x1xf32> to vector<8x256xf32>
    %3 = arith.mulf %0, %2 : vector<8x256xf32>
    %c0_3 = arith.constant 0 : index
    %c0_4 = arith.constant 0 : index
    %4 = vector.load %arg4[%c0_3, %c0_4] : memref<8x1xf32, #tpu.memory_space<vmem>>, vector<8x1xf32>
    %5 = vector.broadcast %4 : vector<8x1xf32> to vector<8x256xf32>
    %6 = arith.addf %3, %5 : vector<8x256xf32>
    %c0_5 = arith.constant 0 : index
    %c0_6 = arith.constant 0 : index
    %7 = vector.load %arg5[%c0_5, %c0_6] : memref<8x256xf32, #tpu.memory_space<vmem>>, vector<8x256xf32>
    tpu.vector_store %arg5[%c0_5, %c0_6], %6 {strides = array<i32>} : memref<8x256xf32, #tpu.memory_space<vmem>>, vector<8x256xf32>,
    return
  }
  func.func @transform_0(%arg0: i32, %arg1: i32) -> (i32, i32) {
    %c0_i32 = arith.constant 0 : i32
    return %arg0, %arg1 : i32, i32
  }
  func.func @transform_1(%arg0: i32, %arg1: i32) -> (i32, i32) {
    %c0_i32 = arith.constant 0 : i32
    %c0_i32_0 = arith.constant 0 : i32
    return %arg0, %c0_i32 : i32, i32
  }
  func.func @transform_2(%arg0: i32, %arg1: i32) -> (i32, i32) {
    %c0_i32 = arith.constant 0 : i32
    %c0_i32_0 = arith.constant 0 : i32
    return %arg0, %c0_i32 : i32, i32
  }
  func.func @transform_3(%arg0: i32, %arg1: i32) -> (i32, i32) {
    %c0_i32 = arith.constant 0 : i32
    return %arg0, %arg1 : i32, i32
  }
}

</mosaic_0001>

<bundles_post_ra>
// kernel: tpu_custom_call.1
= control target key start
LH: loop header
LB: loop body
LE: loop exit
PB: predicated region body
PF: predicated region fallthrough
CT: control target
= control target key end

     0   :  { %s117_s0 = inlined_call_operand.vmem [shape: f32[8,256], index: 0, kind: input, shape index: {}]   ;;  %s118_s1 = inlined_call_operand.vmem [shape: f32[8,1], index: 1, kind: input, shape index: {}]   ;;  %s119_s2 = inlined_call_operand.vmem [shape: f32[8,1], index: 2, kind: input, shape index: {}]   ;;  %s120_s3 = inlined_call_operand.hbm [shape: f32[8,256], index: 3, kind: output, shape index: {}]  }
   0x1   :  { %v17_v0 = vld [vmem:[%s118_s1] sm:$0xff] }
   0x2   :  { %8 = vsyncpa [#allocation3], 0  ;;  %v80_v1 = vmov 0   ;;  %v25_v2 = vld [vmem:[%s119_s2] sm:$0xff]  ;;  %v16_v5 = vld [vmem:[%s117_s0 + $0x8] sm:$0xff]  ;;  %s81_s1 = smov [#allocation2]  }
   0x3   :  { %53 = vset.pattern.permute.xlu0 %v80_v1  ;;  %v15_v4 = vld [vmem:[%s117_s0] sm:$0xff]  ;;  %s40_s20 = sshll.u32 %s81_s1, 4  ;;  %s42_s23 = sshll.u32 %s120_s3, 4  ;;  %s41_s20 = int_to_ptr.vmem [resolvable:$true] %s40_s20  ;;  %s43_s23 = int_to_ptr.hbm [resolvable:$true] %s42_s23 }
   0x4   :  { %20 = vperm.xlu0 %53, %v17_v0  }
   0xc   :  { %28 = vperm.xlu0 %53, %v25_v2  }
  0x76   :  { %v21_v3 = vpop.permute.xlu0 %20 }
  0x77   :  { %v23_v6 = vmul.f32 %v21_v3, %v15_v4  ;;  %v24_v7 = vmul.f32 %v21_v3, %v16_v5 }
  0x7e   :  { %v29_v8 = vpop.permute.xlu0 %28 }
  0x7f   :  { %v31_v9 = vadd.f32 %v29_v8, %v23_v6  ;;  %v32_v10 = vadd.f32 %v29_v8, %v24_v7 }
  0x81   :  { %33 = vst [vmem:[#allocation2] sm:$0xff] %v31_v9 }
  0x82   :  { %34 = vst [vmem:[#allocation2 + $0x8] sm:$0xff] %v32_v10 }
  0x83   :  { %45 = dma.vmem_to_hbm [thread:$0]  %s41_s20, 256, %s43_s23, [#allocation3]  }
  0x84   :  { %78 = dma.done.wait [#allocation3], 256  }
  0x85   :  { %79 = vsyncadd [#allocation3], 4294967040 }
  0x86   :  { %50 = vsyncpa [#allocation3], 1 }

</bundles_post_ra>
